<compile_context>
chip_gen: v7x
topology: tpu7x:2x2x1
jax: 0.10.0
libtpu: 0.0.40
codegen_flags: <defaults>
</compile_context>

<pallas_src>
import functools

import numpy as np
import jax
import jax.numpy as jnp
from jax.experimental import pallas as pl
from jax.experimental.pallas import tpu as pltpu

EPS = 1e-6  # matches torch.nn.functional.pairwise_distance default eps

_LANE = 128
_GRANULE = 8 * _LANE  # minimum (8, 128)-aligned edge-tile


def _round_up(x, m):
    return ((x + m - 1) // m) * m


def _cdiv(a, b):
    return -(-a // b)


def _default_n_splits():
    """2 splits on 2-TensorCore chips (v7x), else 1 (v5e/v6e)."""
    # TODO(synk): verify in an xprof trace that the 'parallel' split axis
    # really lands on both TensorCores on v7x; if not, switch that axis to
    # pltpu.CORE_PARALLEL (or pl.core_map over create_tensorcore_mesh).
    try:
        kind = jax.devices()[0].device_kind.lower().replace(" ", "")
        if "v7" in kind or "tpu7" in kind:
            return 2
    except Exception:
        pass
    return 1


def _edge_std_partial_kernel(diff_ref, psum_ref, psumsq_ref,
                             sum_acc, sumsq_acc, *, ndim):
    """Accumulates per-split (sum of dist, sum of dist^2) over edge tiles.

    diff_ref : (ndim, SUB, 128)   pre-scaled (p1 - p2) + eps, zero on padding
    psum_ref / psumsq_ref : (1, 1, 1) per-split partial outputs
    sum_acc / sumsq_acc   : (SUB, 128) VMEM vector accumulators
    """
    i = pl.program_id(1)          # tile index within split -- "arbitrary"
    n_tiles = pl.num_programs(1)

    @pl.when(i == 0)
    def _init():
        sum_acc[...] = jnp.zeros_like(sum_acc)
        sumsq_acc[...] = jnp.zeros_like(sumsq_acc)

    # Unrolled D-reduction: pure VPU elementwise work on dense (SUB,128) slabs.
    d = diff_ref[0]
    sq = d * d
    for k in range(1, ndim):
        d = diff_ref[k]
        sq = sq + d * d
    dist = jnp.sqrt(sq)

    # Padded lanes hold diff == 0 -> dist == 0, sq == 0: no masking needed.
    sum_acc[...] += dist
    sumsq_acc[...] += sq

    @pl.when(i == n_tiles - 1)
    def _finalize():
        # Single cross-lane/sublane reduce per split; std done in the wrapper.
        psum_ref[...] = jnp.sum(sum_acc[...]).reshape(1, 1, 1)
        psumsq_ref[...] = jnp.sum(sumsq_acc[...]).reshape(1, 1, 1)


def edge_loss(x, edges, size_factor=1.0, tile_e=256 * 1024, n_splits=None):
    """JAX/Pallas equivalent of EdgeLoss.forward(x).

    x:     (V, D) float32 vertex coordinates
    edges: (E, 2) int32 vertex-index pairs
    """
    E = int(edges.shape[0])
    D = int(x.shape[1])
    assert E >= 2, "std with ddof=1 needs at least 2 edges"

    if n_splits is None:
        n_splits = _default_n_splits()
    n_splits = max(1, int(n_splits))
    # Never split so finely that a split would be entirely padding.
    if E < n_splits * _GRANULE:
        n_splits = 1

    # Tile selection: big lane-/sublane-dense tiles, capped to the problem and
    # to a VMEM footprint that fits v7x's 32 MiB scoped default
    # (~32 B of VMEM per edge: 2x double-buffered (D,SUB,128) input blocks plus
    # two (SUB,128) f32 accumulators).
    max_tile_by_problem = _round_up(_cdiv(E, n_splits), _GRANULE)
    max_tile_by_vmem = 512 * 1024            # ~16 MiB footprint worst case
    tile_e = max(_GRANULE, min(int(tile_e), max_tile_by_problem,
                               max_tile_by_vmem))
    tile_e = _round_up(tile_e, _GRANULE)

    edges_per_split = _round_up(_cdiv(E, n_splits), tile_e)
    e_pad = edges_per_split * n_splits
    n_tiles = edges_per_split // tile_e
    sub = tile_e // _LANE                    # sublane extent of one tile
    rows = e_pad // _LANE                    # total (edge-axis) rows

    # Wrapper glue: fused gather-subtract, a single diff array for the kernel.
    # TODO(synk): for very large meshes, fuse this gather into the kernel
    # (keep x resident in VMEM, stream the int32 edge list) to cut HBM traffic
    # to ~8 B/edge.
    x_scaled = x.astype(jnp.float32) * jnp.float32(size_factor)
    p1 = jnp.take(x_scaled, edges[:, 0], axis=0)     # (E, D)
    p2 = jnp.take(x_scaled, edges[:, 1], axis=0)     # (E, D)
    diff = (p1 - p2) + jnp.float32(EPS)              # (E, D)
    if e_pad != E:
        # Zero padding => padded edges contribute exactly 0 to both sums.
        diff = jnp.pad(diff, ((0, e_pad - E), (0, 0)))
    # Edge axis onto (rows, 128): lane-dense AND sublane-dense blocks.
    diff_t = diff.T.reshape(D, rows, _LANE)          # (D, rows, 128)

    kernel = functools.partial(_edge_std_partial_kernel, ndim=D)

    psum, psumsq = pl.pallas_call(
        kernel,
        out_shape=(jax.ShapeDtypeStruct((n_splits, 1, 1), jnp.float32),
                   jax.ShapeDtypeStruct((n_splits, 1, 1), jnp.float32)),
        grid_spec=pltpu.PrefetchScalarGridSpec(
            num_scalar_prefetch=0,
            grid=(n_splits, n_tiles),
            in_specs=[
                pl.BlockSpec((D, sub, _LANE),
                             lambda c, i: (0, c * n_tiles + i, 0)),
            ],
            out_specs=[
                pl.BlockSpec((1, 1, 1), lambda c, i: (c, 0, 0)),
                pl.BlockSpec((1, 1, 1), lambda c, i: (c, 0, 0)),
            ],
            scratch_shapes=[
                pltpu.VMEM((sub, _LANE), jnp.float32),  # running sum of dist
                pltpu.VMEM((sub, _LANE), jnp.float32),  # running sum of dist^2
            ],
        ),
        compiler_params=pltpu.CompilerParams(
            dimension_semantics=("parallel", "arbitrary"),
        ),
    )(diff_t)

    # Finalize (mean / unbiased variance / sqrt) on the combined partials.
    # Note: single-pass variance in f32 can lose precision for huge E with
    # tiny relative variance; the dense per-lane accumulation above keeps this
    # well within tolerance for typical mesh sizes.
    total_sum = jnp.sum(psum)
    total_sumsq = jnp.sum(psumsq)
    e = jnp.float32(E)
    mean = total_sum / e
    var = (total_sumsq - e * mean * mean) / (e - 1.0)   # torch.std: unbiased
    return jnp.sqrt(jnp.maximum(var, 0.0))


def build_edges(faces_np):
    """Replicates EdgeLoss.__init__ edge-set construction (host-side)."""
    edge_set = set()
    for tri in faces_np:
        a, b, c = int(tri[0]), int(tri[1]), int(tri[2])
        edge_set.add((a, b))
        edge_set.add((b, c))
        edge_set.add((a, c))
    edges = sorted(edge_set)  # deterministic order (order doesn't affect std)
    return np.array(edges, dtype=np.int32)


if __name__ == "__main__":
    key = jax.random.PRNGKey(0)
    k_faces, k_x = jax.random.split(key)

    V, D, F = 16, 3, 12          # 16 vertices, 3 coords, 12 triangles
    size_factor = 1.0

    faces = np.asarray(jax.random.randint(k_faces, (F, 3), 0, V),
                       dtype=np.int64)
    edges_np = build_edges(faces)
    edges = jnp.asarray(edges_np)                           # (E, 2) int32
    x = jax.random.normal(k_x, (V, D), dtype=jnp.float32)   # (V, 3) vertices

    out = edge_loss(x, edges, size_factor=size_factor)
    out = jax.block_until_ready(out)

    # Pure-JAX reference (same math as the PyTorch module).
    xs = x * size_factor
    p1 = xs[edges[:, 0]]
    p2 = xs[edges[:, 1]]
    dist = jnp.sqrt(jnp.sum(((p1 - p2) + EPS) ** 2, axis=1))
    ref = jnp.std(dist, ddof=1)
    np.testing.assert_allclose(np.asarray(out), np.asarray(ref),
                               rtol=1e-4, atol=1e-5)

    print("KERNEL_OK")
</pallas_src>

<mosaic_0001>
module attributes {stable_mosaic.version = 11 : i64} {
  func.func @_edge_std_partial_kernel(%arg0: i32, %arg1: i32, %arg2: memref<3x8x128xf32, #tpu.memory_space<vmem>>, %arg3: memref<1x1x1xf32, #tpu.memory_space<vmem>>, %arg4: memref<1x1x1xf32, #tpu.memory_space<vmem>>, %arg5: memref<8x128xf32, #tpu.memory_space<vmem>>, %arg6: memref<8x128xf32, #tpu.memory_space<vmem>>) attributes {dimension_semantics = [#tpu.dimension_semantics<parallel>, #tpu.dimension_semantics<arbitrary>], iteration_bounds = array<i64: 1, 1>, scalar_prefetch = 0 : i64, scratch_operands = 2 : i64, tpu.core_type = #tpu.core_type<tc>, window_params = [{transform_indices = @transform_0, window_bounds = array<i64: 3, 8, 128>}, {transform_indices = @transform_1, window_bounds = array<i64: 1, 1, 1>}, {transform_indices = @transform_2, window_bounds = array<i64: 1, 1, 1>}]} {
    %c0_i32 = arith.constant 0 : i32
    %0 = arith.cmpi eq, %arg1, %c0_i32 : i32
    %1 = arith.extui %0 : i1 to i32
    %c0_i32_0 = arith.constant 0 : i32
    %2 = arith.cmpi ne, %1, %c0_i32_0 : i32
    scf.if %2 {
      %cst = arith.constant 0.000000e+00 : f32
      %24 = vector.broadcast %cst : f32 to vector<8x128xf32>
      %c0_17 = arith.constant 0 : index
      %c0_18 = arith.constant 0 : index
      %25 = vector.load %arg5[%c0_17, %c0_18] : memref<8x128xf32, #tpu.memory_space<vmem>>, vector<8x128xf32>
      tpu.vector_store %arg5[%c0_17, %c0_18], %24 {strides = array<i32>} : memref<8x128xf32, #tpu.memory_space<vmem>>, vector<8x128xf32>,
      %cst_19 = arith.constant 0.000000e+00 : f32
      %26 = vector.broadcast %cst_19 : f32 to vector<8x128xf32>
      %c0_20 = arith.constant 0 : index
      %c0_21 = arith.constant 0 : index
      %27 = vector.load %arg6[%c0_20, %c0_21] : memref<8x128xf32, #tpu.memory_space<vmem>>, vector<8x128xf32>
      tpu.vector_store %arg6[%c0_20, %c0_21], %26 {strides = array<i32>} : memref<8x128xf32, #tpu.memory_space<vmem>>, vector<8x128xf32>,
    } else {
    }
    %c0 = arith.constant 0 : index
    %c0_1 = arith.constant 0 : index
    %c0_2 = arith.constant 0 : index
    %3 = vector.load %arg2[%c0, %c0_1, %c0_2] : memref<3x8x128xf32, #tpu.memory_space<vmem>>, vector<1x8x128xf32>
    %4 = vector.shape_cast %3 : vector<1x8x128xf32> to vector<8x128xf32>
    %5 = arith.mulf %4, %4 : vector<8x128xf32>
    %c1 = arith.constant 1 : index
    %c0_3 = arith.constant 0 : index
    %c0_4 = arith.constant 0 : index
    %6 = vector.load %arg2[%c1, %c0_3, %c0_4] : memref<3x8x128xf32, #tpu.memory_space<vmem>>, vector<1x8x128xf32>
    %7 = vector.shape_cast %6 : vector<1x8x128xf32> to vector<8x128xf32>
    %8 = arith.mulf %7, %7 : vector<8x128xf32>
    %9 = arith.addf %5, %8 : vector<8x128xf32>
    %c2 = arith.constant 2 : index
    %c0_5 = arith.constant 0 : index
    %c0_6 = arith.constant 0 : index
    %10 = vector.load %arg2[%c2, %c0_5, %c0_6] : memref<3x8x128xf32, #tpu.memory_space<vmem>>, vector<1x8x128xf32>
    %11 = vector.shape_cast %10 : vector<1x8x128xf32> to vector<8x128xf32>
    %12 = arith.mulf %11, %11 : vector<8x128xf32>
    %13 = arith.addf %9, %12 : vector<8x128xf32>
    %14 = math.sqrt %13 : vector<8x128xf32>
    %c0_7 = arith.constant 0 : index
    %c0_8 = arith.constant 0 : index
    %15 = vector.load %arg5[%c0_7, %c0_8] : memref<8x128xf32, #tpu.memory_space<vmem>>, vector<8x128xf32>
    %16 = arith.addf %15, %14 : vector<8x128xf32>
    %c0_9 = arith.constant 0 : index
    %c0_10 = arith.constant 0 : index
    %17 = vector.load %arg5[%c0_9, %c0_10] : memref<8x128xf32, #tpu.memory_space<vmem>>, vector<8x128xf32>
    tpu.vector_store %arg5[%c0_9, %c0_10], %16 {strides = array<i32>} : memref<8x128xf32, #tpu.memory_space<vmem>>, vector<8x128xf32>,
    %c0_11 = arith.constant 0 : index
    %c0_12 = arith.constant 0 : index
    %18 = vector.load %arg6[%c0_11, %c0_12] : memref<8x128xf32, #tpu.memory_space<vmem>>, vector<8x128xf32>
    %19 = arith.addf %18, %13 : vector<8x128xf32>
    %c0_13 = arith.constant 0 : index
    %c0_14 = arith.constant 0 : index
    %20 = vector.load %arg6[%c0_13, %c0_14] : memref<8x128xf32, #tpu.memory_space<vmem>>, vector<8x128xf32>
    tpu.vector_store %arg6[%c0_13, %c0_14], %19 {strides = array<i32>} : memref<8x128xf32, #tpu.memory_space<vmem>>, vector<8x128xf32>,
    %c0_i32_15 = arith.constant 0 : i32
    %21 = arith.cmpi eq, %arg1, %c0_i32_15 : i32
    %22 = arith.extui %21 : i1 to i32
    %c0_i32_16 = arith.constant 0 : i32
    %23 = arith.cmpi ne, %22, %c0_i32_16 : i32
    scf.if %23 {
      %c0_17 = arith.constant 0 : index
      %c0_18 = arith.constant 0 : index
      %24 = vector.load %arg5[%c0_17, %c0_18] : memref<8x128xf32, #tpu.memory_space<vmem>>, vector<8x128xf32>
      %25 = vector.shape_cast %24 : vector<8x128xf32> to vector<1x8x128xf32>
      %cst = arith.constant dense<0.000000e+00> : vector<1xf32>
      %26 = vector.multi_reduction <add>, %25, %cst [1, 2] : vector<1x8x128xf32> to vector<1xf32>
      %27 = vector.shape_cast %26 : vector<1xf32> to vector<1x1x1xf32>
      %28 = vector.extract %27[0, 0, 0] : f32 from vector<1x1x1xf32>
      %29 = vector.broadcast %28 : f32 to vector<1x1x1xf32>
      %c0_19 = arith.constant 0 : index
      %c0_20 = arith.constant 0 : index
      %c0_21 = arith.constant 0 : index
      %30 = vector.load %arg3[%c0_19, %c0_20, %c0_21] : memref<1x1x1xf32, #tpu.memory_space<vmem>>, vector<1x1x1xf32>
      tpu.vector_store %arg3[%c0_19, %c0_20, %c0_21], %29 {strides = array<i32>} : memref<1x1x1xf32, #tpu.memory_space<vmem>>, vector<1x1x1xf32>,
      %c0_22 = arith.constant 0 : index
      %c0_23 = arith.constant 0 : index
      %31 = vector.load %arg6[%c0_22, %c0_23] : memref<8x128xf32, #tpu.memory_space<vmem>>, vector<8x128xf32>
      %32 = vector.shape_cast %31 : vector<8x128xf32> to vector<1x8x128xf32>
      %cst_24 = arith.constant dense<0.000000e+00> : vector<1xf32>
      %33 = vector.multi_reduction <add>, %32, %cst_24 [1, 2] : vector<1x8x128xf32> to vector<1xf32>
      %34 = vector.shape_cast %33 : vector<1xf32> to vector<1x1x1xf32>
      %35 = vector.extract %34[0, 0, 0] : f32 from vector<1x1x1xf32>
      %36 = vector.broadcast %35 : f32 to vector<1x1x1xf32>
      %c0_25 = arith.constant 0 : index
      %c0_26 = arith.constant 0 : index
      %c0_27 = arith.constant 0 : index
      %37 = vector.load %arg4[%c0_25, %c0_26, %c0_27] : memref<1x1x1xf32, #tpu.memory_space<vmem>>, vector<1x1x1xf32>
      tpu.vector_store %arg4[%c0_25, %c0_26, %c0_27], %36 {strides = array<i32>} : memref<1x1x1xf32, #tpu.memory_space<vmem>>, vector<1x1x1xf32>,
    } else {
    }
    return
  }
  func.func @transform_0(%arg0: i32, %arg1: i32) -> (i32, i32, i32) {
    %c1_i32 = arith.constant 1 : i32
    %0 = arith.muli %arg0, %c1_i32 : i32
    %1 = arith.addi %0, %arg1 : i32
    %c0_i32 = arith.constant 0 : i32
    %c0_i32_0 = arith.constant 0 : i32
    %c0_i32_1 = arith.constant 0 : i32
    return %c0_i32, %1, %c0_i32_0 : i32, i32, i32
  }
  func.func @transform_1(%arg0: i32, %arg1: i32) -> (i32, i32, i32) {
    %c0_i32 = arith.constant 0 : i32
    %c0_i32_0 = arith.constant 0 : i32
    %c0_i32_1 = arith.constant 0 : i32
    return %arg0, %c0_i32, %c0_i32_0 : i32, i32, i32
  }
  func.func @transform_2(%arg0: i32, %arg1: i32) -> (i32, i32, i32) {
    %c0_i32 = arith.constant 0 : i32
    %c0_i32_0 = arith.constant 0 : i32
    %c0_i32_1 = arith.constant 0 : i32
    return %arg0, %c0_i32, %c0_i32_0 : i32, i32, i32
  }
}

</mosaic_0001>

<bundles_post_ra>
// kernel: tpu_custom_call.1
= control target key start
LH: loop header
LB: loop body
LE: loop exit
PB: predicated region body
PF: predicated region fallthrough
CT: control target
= control target key end

     0   :  { %8 = vsyncpa [#allocation5], 0  ;;  %s257_s0 = inlined_call_operand.hbm [shape: f32[3,8,128], index: 0, kind: input, shape index: {}]   ;;  %s258_s1 = inlined_call_operand.hbm [shape: f32[1,1,1], index: 1, kind: output, shape index: {0}]   ;;  %s259_s2 = inlined_call_operand.hbm [shape: f32[1,1,1], index: 2, kind: output, shape index: {1}]  }
   0x1   :  { %9 = vsyncpa [#allocation6], 0 }
   0x2   :  { %10 = vsyncpa [#allocation9], 0  ;;  %s199_s9 = smov [#allocation4]   ;;  %s127_s13 = scalar_lea.hbm %s257_s0, 384 }
   0x3   :  { %s19_s10 = sshll.u32 %s199_s9, 4  ;;  %p128_p0 = scmp.ne.s32.totalorder %s257_s0, %s127_s13  ;;  %s20_s10 = int_to_ptr.vmem [resolvable:$true] %s19_s10 }
   0x4   :  { %p131_p1 = scmp.lt.u32.totalorder %s127_s13, %s257_s0 }
   0x6   :  { %p133_p2 = pnand %p131_p1, %p128_p0 }
   0x8   :  { %136 = shalt.err (!%p133_p2)
}
   0x9   :  { %s137_s18 = scalar_lea.vmem %s20_s10, 384  ;;  %p142_p4 = scmp.lt.s32.totalorder %s20_s10, %s20_s10 }
   0xa   :  { %p138_p3 = scmp.ne.s32.totalorder %s20_s10, %s137_s18  ;;  %p143_p5 = scmp.lt.s32.totalorder %s137_s18, %s137_s18 }
   0xc   :  { %p144_p6 = por %p143_p5, %p142_p4 }
   0xe   :  { %p145_p7 = pnand %p144_p6, %p138_p3 }
  0x10   :  { %148 = shalt.err (!%p145_p7)
}
  0x11   :  { %s200_s19 = smov 128   ;;  %s201_s20 = smov 8  }
  0x12   :  { %25 = dma.hbm_to_vmem [thread:$0]  %s257_s0, 384, %s20_s10, [#allocation5], %s200_s19, %s200_s19, %s201_s20  }
  0x13   :  { %193 = dma.done.wait [#allocation5], 384  }
  0x14   :  { %194 = vsyncadd [#allocation5], 4294966912  ;;  %v36_v0 = vld [vmem:[#allocation4] sm:$0xff]  ;;  %v39_v1 = vld [vmem:[#allocation4 + $0x8] sm:$0xff]  ;;  %s202_s0 = smov [#allocation7]   ;;  %vm73_vm2 = vcmask 0  }
  0x15   :  { %v43_v2 = vld [vmem:[#allocation4 + $0x10] sm:$0xff]  ;;  %v37_v3 = vmul.f32 %v36_v0, %v36_v0  ;;  %v40_v4 = vmul.f32 %v39_v1, %v39_v1  ;;  %s93_s23 = sshll.u32 %s202_s0, 4  ;;  %s203_s25 = smov [#allocation8]   ;;  %s94_s23 = int_to_ptr.vmem [resolvable:$true] %s93_s23 }
  0x16   :  { %v44_v5 = vmul.f32 %v43_v2, %v43_v2  ;;  %s103_s26 = sshll.u32 %s203_s25, 4  ;;  %s149_s27 = scalar_lea.vmem %s94_s23, 16  ;;  %s104_s26 = int_to_ptr.vmem [resolvable:$true] %s103_s26 }
  0x17   :  { %v41_v6 = vadd.f32 %v40_v4, %v37_v3  ;;  %p150_p8 = scmp.ne.s32.totalorder %s94_s23, %s149_s27  ;;  %s153_s28 = scalar_lea.vmem %s94_s23, 32 }
  0x18   :  { %p154_p9 = scmp.lt.s32.totalorder %s94_s23, %s94_s23  ;;  %p155_p10 = scmp.lt.s32.totalorder %s153_s28, %s149_s27 }
  0x19   :  { %v45_v7 = vadd.f32 %v44_v5, %v41_v6 }
  0x1a   :  { %p156_p11 = por %p155_p10, %p154_p9 }
  0x1b   :  { %125 = vrsqrt.f32 %v45_v7  ;;  %vm48_vm0 = vcmp.eq.f32.partialorder %v45_v7, inf  ;;  %v51_v9 = vand.u32 2147483648, %v45_v7  ;;  %vm50_vm1 = vcmp.eq.f32.partialorder %v45_v7, 0.0 }
  0x1c   :  { %p157_p12 = pnand %p156_p11, %p150_p8 }
  0x25   :  { %v126_v8 = vpop.eup %125 }
  0x26   :  { %v47_v10 = vmul.f32 %v126_v8, %v45_v7 }
  0x28   :  { %v49_v11 = vsel %vm48_vm0, %v45_v7, %v47_v10 }
  0x29   :  { %v52_v12 = vsel %vm50_vm1, %v51_v9, %v49_v11 }
  0x2a   :  { %63 = vadd.xlane.f32.xlu0 %v52_v12 }
  0x2e   :  { %76 = vadd.xlane.f32.xlu0 %v45_v7 }
  0xb7   :  { %v64_v13 = vpop.xlane.xlu0 %63 }
  0xb8   :  { %v65_v14 = vrot.slane %v64_v13, 4 }
  0xba   :  { %v66_v15 = vadd.f32 %v65_v14, %v64_v13 }
  0xbb   :  { %v77_v16 = vpop.xlane.xlu0 %76 }
  0xbc   :  { %v67_v17 = vrot.slane %v66_v15, 2  ;;  %v78_v18 = vrot.slane %v77_v16, 4 }
  0xbe   :  { %v79_v19 = vadd.f32 %v78_v18, %v77_v16  ;;  %v68_v20 = vadd.f32 %v67_v17, %v66_v15 }
  0xc0   :  { %v80_v21 = vrot.slane %v79_v19, 2  ;;  %v69_v22 = vrot.slane %v68_v20, 1 }
  0xc2   :  { %v81_v23 = vadd.f32 %v80_v21, %v79_v19  ;;  %v70_v24 = vadd.f32 %v69_v22, %v68_v20 }
  0xc4   :  { %116 = vpush %v70_v24  ;;  %v82_v25 = vrot.slane %v81_v23, 1 }
  0xc6   :  { %v83_v26 = vadd.f32 %v82_v25, %v81_v23 }
  0xc8   :  { %118 = vpush %v83_v26 }
  0xf5   :  { %s117_s24 = spop %116 }
  0xf6   :  { %v72_v27 = vstv %s117_s24 }
  0xf7   :  { %74 = vst.msk [vmem:[#allocation7] sm:$0x1] %vm73_vm2, %v72_v27 }
  0xf8   :  { %160 = shalt.err (!%p157_p12)
}
  0xf9   :  { %s161_s3 = scalar_lea.hbm %s258_s1, 16 }
  0xfa   :  { %p162_p13 = scmp.ne.s32.totalorder %s258_s1, %s161_s3  ;;  %p165_p0 = scmp.lt.u32.totalorder %s161_s3, %s258_s1 }
  0xfc   :  { %p167_p1 = pnand %p165_p0, %p162_p13 }
  0xfe   :  { %170 = shalt.err (!%p167_p1)
}
  0xff   :  { %96 = dma.vmem_to_hbm [thread:$0]  %s94_s23, 16, %s258_s1, [#allocation6]  }
 0x100   :  { %s119_s10 = spop %118  ;;  %s171_s11 = scalar_lea.vmem %s104_s26, 16 }
 0x101   :  { %v85_v28 = vstv %s119_s10  ;;  %p172_p2 = scmp.ne.s32.totalorder %s104_s26, %s171_s11  ;;  %s175_s12 = scalar_lea.vmem %s104_s26, 32 }
 0x102   :  { %86 = vst.msk [vmem:[#allocation8] sm:$0x1] %vm73_vm2, %v85_v28  ;;  %p176_p3 = scmp.lt.s32.totalorder %s104_s26, %s104_s26  ;;  %p177_p4 = scmp.lt.s32.totalorder %s175_s12, %s171_s11 }
 0x104   :  { %p178_p5 = por %p177_p4, %p176_p3 }
 0x106   :  { %p179_p6 = pnand %p178_p5, %p172_p2 }
 0x108   :  { %182 = shalt.err (!%p179_p6)
}
 0x109   :  { %s183_s15 = scalar_lea.hbm %s259_s2, 16 }
 0x10a   :  { %p184_p7 = scmp.ne.s32.totalorder %s259_s2, %s183_s15  ;;  %p187_p8 = scmp.lt.u32.totalorder %s183_s15, %s259_s2 }
 0x10c   :  { %p189_p9 = pnand %p187_p8, %p184_p7 }
 0x10e   :  { %192 = shalt.err (!%p189_p9)
}
 0x10f   :  { %106 = dma.vmem_to_hbm [thread:$0]  %s104_s26, 16, %s259_s2, [#allocation9]  }
 0x110   :  { %195 = dma.done.wait [#allocation6], 16  }
 0x111   :  { %196 = vsyncadd [#allocation6], 4294967280 }
 0x112   :  { %197 = dma.done.wait [#allocation9], 16  }
 0x113   :  { %198 = vsyncadd [#allocation9], 4294967280 }
 0x114   :  { %113 = vsyncpa [#allocation5], 1 }
 0x115   :  { %114 = vsyncpa [#allocation6], 1 }
 0x116   :  { %115 = vsyncpa [#allocation9], 1 }

</bundles_post_ra>
